<compile_context>
chip_gen: v7x
topology: tpu7x:2x2x1
jax: 0.10.0
libtpu: 0.0.40
codegen_flags: <defaults>
</compile_context>

<pallas_src>
import functools
import math

import jax
import jax.numpy as jnp
from jax.experimental import pallas as pl
from jax.experimental.pallas import tpu as pltpu


# ----------------------------- tiling helper --------------------------------

def _choose_tile(dim, pref, align):
    """Full dim if small; else the largest multiple of `align` (<= pref) that
    divides `dim` exactly; else the full dim (no padded blocks -> always
    correct for reduction axes)."""
    if dim <= pref:
        return dim
    t = (pref // align) * align
    while t >= align:
        if dim % t == 0:
            return t
        t -= align
    return dim


# ------------------------------- LayerNorm -----------------------------------

def _layernorm_kernel(x_ref, g_ref, b_ref, o_ref, *, eps):
    x = x_ref[...].astype(jnp.float32)
    c = x.shape[-1]
    mean = jnp.mean(x, axis=-1, keepdims=True)
    d = x - mean
    # torch.Tensor.std is the unbiased estimator (ddof = 1); eps added to std.
    var = jnp.sum(d * d, axis=-1, keepdims=True) / (c - 1)
    inv = 1.0 / (jnp.sqrt(var) + eps)
    y = g_ref[...].astype(jnp.float32) * d * inv + b_ref[...].astype(jnp.float32)
    o_ref[...] = y.astype(o_ref.dtype)


def layer_norm(x2d, gamma, beta, *, eps=1e-6, tm=256):
    M, C = x2d.shape
    tm = _choose_tile(M, tm, 8)
    return pl.pallas_call(
        functools.partial(_layernorm_kernel, eps=eps),
        out_shape=jax.ShapeDtypeStruct((M, C), x2d.dtype),
        grid_spec=pltpu.PrefetchScalarGridSpec(
            num_scalar_prefetch=0,
            grid=(pl.cdiv(M, tm),),
            in_specs=[
                pl.BlockSpec((tm, C), lambda i: (i, 0)),
                pl.BlockSpec((1, C), lambda i: (0, 0)),
                pl.BlockSpec((1, C), lambda i: (0, 0)),
            ],
            out_specs=pl.BlockSpec((tm, C), lambda i: (i, 0)),
        ),
        compiler_params=pltpu.CompilerParams(dimension_semantics=("parallel",)),
    )(x2d, gamma.reshape(1, C), beta.reshape(1, C))


# ----------------------- Linear (+bias, +ReLU, +residual) --------------------

def _linear_kernel(x_ref, w_ref, b_ref, o_ref, acc_ref, *, activation):
    @pl.when(pl.program_id(2) == 0)
    def _():
        acc_ref[...] = jnp.zeros_like(acc_ref)

    acc_ref[...] += jnp.dot(x_ref[...], w_ref[...],
                            preferred_element_type=jnp.float32)

    @pl.when(pl.program_id(2) == pl.num_programs(2) - 1)
    def _():
        y = acc_ref[...] + b_ref[...].astype(jnp.float32)
        if activation == "relu":
            y = jnp.maximum(y, 0.0)
        o_ref[...] = y.astype(o_ref.dtype)


def _linear_residual_kernel(x_ref, w_ref, b_ref, r_ref, o_ref, acc_ref):
    @pl.when(pl.program_id(2) == 0)
    def _():
        acc_ref[...] = jnp.zeros_like(acc_ref)

    acc_ref[...] += jnp.dot(x_ref[...], w_ref[...],
                            preferred_element_type=jnp.float32)

    @pl.when(pl.program_id(2) == pl.num_programs(2) - 1)
    def _():
        y = (acc_ref[...] + b_ref[...].astype(jnp.float32)
             + r_ref[...].astype(jnp.float32))
        o_ref[...] = y.astype(o_ref.dtype)


def linear(x2d, w, b, *, residual=None, activation="none",
           tm=256, tn=1024, tk=512):
    """y = act(x2d @ w + b) [+ residual];  x2d: (M, K), w: (K, N), b: (N,)."""
    M, K = x2d.shape
    K2, N = w.shape
    assert K == K2
    tm = _choose_tile(M, tm, 8)
    tn = _choose_tile(N, tn, 128)
    tk = _choose_tile(K, tk, 128)
    grid = (pl.cdiv(M, tm), pl.cdiv(N, tn), pl.cdiv(K, tk))

    in_specs = [
        pl.BlockSpec((tm, tk), lambda i, j, k: (i, k)),
        pl.BlockSpec((tk, tn), lambda i, j, k: (k, j)),
        pl.BlockSpec((1, tn), lambda i, j, k: (0, j)),
    ]
    args = [x2d, w, b.reshape(1, N)]
    if residual is not None:
        in_specs.append(pl.BlockSpec((tm, tn), lambda i, j, k: (i, j)))
        args.append(residual)
        kernel = _linear_residual_kernel
    else:
        kernel = functools.partial(_linear_kernel, activation=activation)

    cost = pl.CostEstimate(
        flops=2 * int(M) * int(N) * int(K),
        transcendentals=0,
        bytes_accessed=4 * (int(M) * int(K) + int(K) * int(N) + int(M) * int(N)),
    )
    return pl.pallas_call(
        kernel,
        out_shape=jax.ShapeDtypeStruct((M, N), x2d.dtype),
        grid_spec=pltpu.PrefetchScalarGridSpec(
            num_scalar_prefetch=0,
            grid=grid,
            in_specs=in_specs,
            out_specs=pl.BlockSpec((tm, tn), lambda i, j, k: (i, j)),
            scratch_shapes=[pltpu.VMEM((tm, tn), jnp.float32)],
        ),
        compiler_params=pltpu.CompilerParams(
            dimension_semantics=("parallel", "parallel", "arbitrary")),
        cost_estimate=cost,
    )(*args)


# --------------------- Flash-style multi-head attention ----------------------

def _mha_kernel(q_ref, k_ref, v_ref, mask_ref, o_ref,
                m_sc, l_sc, acc_sc, *, scale):
    kv = pl.program_id(2)

    @pl.when(kv == 0)
    def _():
        m_sc[...] = jnp.full(m_sc.shape, -jnp.inf, jnp.float32)
        l_sc[...] = jnp.zeros(l_sc.shape, jnp.float32)
        acc_sc[...] = jnp.zeros(acc_sc.shape, jnp.float32)

    q = q_ref[...].astype(jnp.float32)
    k = k_ref[...].astype(jnp.float32)
    s = jnp.dot(q, k.T, preferred_element_type=jnp.float32) * scale
    s = jnp.where(mask_ref[...] > 0, s, -1e9)

    m_prev = m_sc[...]
    m_new = jnp.maximum(m_prev, jnp.max(s, axis=-1, keepdims=True))
    alpha = jnp.exp(m_prev - m_new)
    p = jnp.exp(s - m_new)
    l_sc[...] = alpha * l_sc[...] + jnp.sum(p, axis=-1, keepdims=True)
    acc_sc[...] = alpha * acc_sc[...] + jnp.dot(
        p, v_ref[...].astype(jnp.float32), preferred_element_type=jnp.float32)
    m_sc[...] = m_new

    @pl.when(kv == pl.num_programs(2) - 1)
    def _():
        o_ref[...] = (acc_sc[...] / l_sc[...]).astype(o_ref.dtype)


def multi_head_attention(q, k, v, mask, *, tq=256, tkv=512):
    """q: (BH, Sq, dk); k, v: (BH, Sk, dk); mask: (BH, Sq, Sk), nonzero = keep."""
    BH, Sq, dk = q.shape
    Sk = k.shape[1]
    tq = _choose_tile(Sq, tq, 8)
    tkv = _choose_tile(Sk, tkv, 128)
    scale = 1.0 / math.sqrt(dk)
    grid = (BH, pl.cdiv(Sq, tq), pl.cdiv(Sk, tkv))

    cost = pl.CostEstimate(
        flops=4 * int(BH) * int(Sq) * int(Sk) * int(dk),
        transcendentals=2 * int(BH) * int(Sq) * int(Sk),
        bytes_accessed=4 * (int(q.size) + int(k.size) + int(v.size)
                            + int(mask.size) + int(q.size)),
    )
    return pl.pallas_call(
        functools.partial(_mha_kernel, scale=scale),
        out_shape=jax.ShapeDtypeStruct((BH, Sq, dk), q.dtype),
        grid_spec=pltpu.PrefetchScalarGridSpec(
            num_scalar_prefetch=0,
            grid=grid,
            in_specs=[
                pl.BlockSpec((None, tq, dk), lambda b, i, j: (b, i, 0)),
                pl.BlockSpec((None, tkv, dk), lambda b, i, j: (b, j, 0)),
                pl.BlockSpec((None, tkv, dk), lambda b, i, j: (b, j, 0)),
                pl.BlockSpec((None, tq, tkv), lambda b, i, j: (b, i, j)),
            ],
            out_specs=pl.BlockSpec((None, tq, dk), lambda b, i, j: (b, i, 0)),
            scratch_shapes=[
                pltpu.VMEM((tq, 1), jnp.float32),    # running max
                pltpu.VMEM((tq, 1), jnp.float32),    # running sum
                pltpu.VMEM((tq, dk), jnp.float32),   # output accumulator
            ],
        ),
        compiler_params=pltpu.CompilerParams(
            dimension_semantics=("parallel", "parallel", "arbitrary")),
        cost_estimate=cost,
    )(q, k, v, mask)


# ----------------------------- DecoderLayer ----------------------------------

def _split_heads(x2d, B, S, H):
    C = x2d.shape[-1]
    dk = C // H
    return x2d.reshape(B, S, H, dk).transpose(0, 2, 1, 3).reshape(B * H, S, dk)


def _merge_heads(x, B, S, H):
    dk = x.shape[-1]
    return x.reshape(B, H, S, dk).transpose(0, 2, 1, 3).reshape(B * S, H * dk)


def _attention_block(q_in2d, kv_in2d, mask, prefix, params, B, Sq, Sk):
    H = params["n_heads"]
    wq, bq = params[prefix + "_q"]
    wk, bk = params[prefix + "_k"]
    wv, bv = params[prefix + "_v"]
    qh = _split_heads(linear(q_in2d, wq, bq), B, Sq, H)
    kh = _split_heads(linear(kv_in2d, wk, bk), B, Sk, H)
    vh = _split_heads(linear(kv_in2d, wv, bv), B, Sk, H)
    mask_bh = jnp.broadcast_to(mask[:, None, :, :].astype(jnp.float32),
                               (B, H, Sq, Sk)).reshape(B * H, Sq, Sk)
    attn = multi_head_attention(qh, kh, vh, mask_bh)
    return _merge_heads(attn, B, Sq, H)


def decoder_layer(params, x, memory, src_mask, tag_mask):
    """x: (B, Sq, C), memory: (B, Sk, C), src_mask: (B, Sq, Sk), tag_mask: (B, Sq, Sq)."""
    # TODO(synk): dropout is treated as identity (inference / p=0); training
    # dropout would use pltpu.prng_seed / prng_random_bits masking.
    B, Sq, C = x.shape
    Sk = memory.shape[1]
    x2d = x.reshape(B * Sq, C)
    m2d = memory.reshape(B * Sk, C)

    # --- sublayer 0: masked self-attention -----------------------------------
    g, b = params["ln"][0]
    n0 = layer_norm(x2d, g, b)
    a0 = _attention_block(n0, n0, tag_mask, "self", params, B, Sq, Sq)
    wo, bo = params["self_o"]
    x2d = linear(a0, wo, bo, residual=x2d)

    # --- sublayer 1: source (cross) attention over encoder memory ------------
    g, b = params["ln"][1]
    n1 = layer_norm(x2d, g, b)
    a1 = _attention_block(n1, m2d, src_mask, "src", params, B, Sq, Sk)
    wo, bo = params["src_o"]
    x2d = linear(a1, wo, bo, residual=x2d)

    # --- sublayer 2: position-wise feed-forward -------------------------------
    g, b = params["ln"][2]
    n2 = layer_norm(x2d, g, b)
    w1, b1 = params["ffn_1"]
    w2, b2 = params["ffn_2"]
    h = linear(n2, w1, b1, activation="relu")
    x2d = linear(h, w2, b2, residual=x2d)

    return x2d.reshape(B, Sq, C)


# ------------------------- parameters & reference ----------------------------

def init_decoder_params(key, c_model, n_heads, d_ff):
    def linear_init(k, fan_in, fan_out):
        k1, k2 = jax.random.split(k)
        bound = 1.0 / math.sqrt(fan_in)
        w = jax.random.uniform(k1, (fan_in, fan_out), jnp.float32, -bound, bound)
        b = jax.random.uniform(k2, (fan_out,), jnp.float32, -bound, bound)
        return w, b

    keys = jax.random.split(key, 10)
    return {
        "self_q": linear_init(keys[0], c_model, c_model),
        "self_k": linear_init(keys[1], c_model, c_model),
        "self_v": linear_init(keys[2], c_model, c_model),
        "self_o": linear_init(keys[3], c_model, c_model),
        "src_q": linear_init(keys[4], c_model, c_model),
        "src_k": linear_init(keys[5], c_model, c_model),
        "src_v": linear_init(keys[6], c_model, c_model),
        "src_o": linear_init(keys[7], c_model, c_model),
        "ffn_1": linear_init(keys[8], c_model, d_ff),
        "ffn_2": linear_init(keys[9], d_ff, c_model),
        "ln": [(jnp.ones((c_model,), jnp.float32),
                jnp.zeros((c_model,), jnp.float32)) for _ in range(3)],
        "n_heads": n_heads,
    }


def _reference_decoder_layer(params, x, memory, src_mask, tag_mask, eps=1e-6):
    H = params["n_heads"]

    def ln(y, g, b):
        mean = y.mean(-1, keepdims=True)
        var = jnp.sum((y - mean) ** 2, -1, keepdims=True) / (y.shape[-1] - 1)
        return g * (y - mean) / (jnp.sqrt(var) + eps) + b

    def lin(y, wb):
        w, b = wb
        return y @ w + b

    def attn(xq, xkv, mask, prefix):
        B, Sq, C = xq.shape
        Sk = xkv.shape[1]
        dk = C // H
        q = lin(xq, params[prefix + "_q"]).reshape(B, Sq, H, dk).transpose(0, 2, 1, 3)
        k = lin(xkv, params[prefix + "_k"]).reshape(B, Sk, H, dk).transpose(0, 2, 1, 3)
        v = lin(xkv, params[prefix + "_v"]).reshape(B, Sk, H, dk).transpose(0, 2, 1, 3)
        s = jnp.einsum("bhqd,bhkd->bhqk", q, k) / math.sqrt(dk)
        s = jnp.where(mask[:, None, :, :] > 0, s, -1e9)
        p = jax.nn.softmax(s, axis=-1)
        o = jnp.einsum("bhqk,bhkd->bhqd", p, v)
        o = o.transpose(0, 2, 1, 3).reshape(B, Sq, C)
        return lin(o, params[prefix + "_o"])

    g, b = params["ln"][0]
    n = ln(x, g, b)
    x = x + attn(n, n, tag_mask, "self")
    g, b = params["ln"][1]
    n = ln(x, g, b)
    x = x + attn(n, memory, src_mask, "src")
    g, b = params["ln"][2]
    n = ln(x, g, b)
    h = jnp.maximum(lin(n, params["ffn_1"]), 0.0)
    return x + lin(h, params["ffn_2"])


# ---------------------------------- main --------------------------------------

if __name__ == "__main__":
    B, S_dec, S_enc, c_model, n_heads, d_ff = 2, 8, 8, 32, 4, 64

    key = jax.random.PRNGKey(0)
    kp, kx, km = jax.random.split(key, 3)

    params = init_decoder_params(kp, c_model, n_heads, d_ff)
    x = jax.random.normal(kx, (B, S_dec, c_model), dtype=jnp.float32)
    memory = jax.random.normal(km, (B, S_enc, c_model), dtype=jnp.float32)

    # causal target mask + per-batch source lengths [8, 6]
    tag_mask = jnp.broadcast_to(
        jnp.tril(jnp.ones((S_dec, S_dec), jnp.float32)), (B, S_dec, S_dec))
    lengths = jnp.array([S_enc, S_enc - 2], dtype=jnp.int32)
    src_mask = (jnp.arange(S_enc)[None, None, :] < lengths[:, None, None])
    src_mask = jnp.broadcast_to(src_mask, (B, S_dec, S_enc)).astype(jnp.float32)

    out = decoder_layer(params, x, memory, src_mask, tag_mask)
    out = jax.block_until_ready(out)

    with jax.default_matmul_precision("float32"):
        ref = _reference_decoder_layer(params, x, memory, src_mask, tag_mask)
        ref = jax.block_until_ready(ref)

    assert out.shape == (B, S_dec, c_model)
    assert jnp.allclose(out, ref, atol=2e-3, rtol=2e-3), (
        float(jnp.max(jnp.abs(out - ref))))

    print("KERNEL_OK")
</pallas_src>

<mosaic_0001>
module attributes {stable_mosaic.version = 11 : i64} {
  func.func @_layernorm_kernel(%arg0: i32, %arg1: memref<16x32xf32, #tpu.memory_space<vmem>>, %arg2: memref<1x32xf32, #tpu.memory_space<vmem>>, %arg3: memref<1x32xf32, #tpu.memory_space<vmem>>, %arg4: memref<16x32xf32, #tpu.memory_space<vmem>>) attributes {dimension_semantics = [#tpu.dimension_semantics<parallel>], iteration_bounds = array<i64: 1>, scalar_prefetch = 0 : i64, scratch_operands = 0 : i64, tpu.core_type = #tpu.core_type<tc>, window_params = [{transform_indices = @transform_0, window_bounds = array<i64: 16, 32>}, {pipeline_mode = #tpu.pipeline_mode<synchronous>, transform_indices = @transform_1, window_bounds = array<i64: 1, 32>}, {pipeline_mode = #tpu.pipeline_mode<synchronous>, transform_indices = @transform_2, window_bounds = array<i64: 1, 32>}, {transform_indices = @transform_3, window_bounds = array<i64: 16, 32>}]} {
    %c0 = arith.constant 0 : index
    %c0_0 = arith.constant 0 : index
    %0 = vector.load %arg1[%c0, %c0_0] : memref<16x32xf32, #tpu.memory_space<vmem>>, vector<16x32xf32>
    %cst = arith.constant dense<0.000000e+00> : vector<16xf32>
    %1 = vector.multi_reduction <add>, %0, %cst [1] : vector<16x32xf32> to vector<16xf32>
    %2 = vector.shape_cast %1 : vector<16xf32> to vector<16x1xf32>
    %cst_1 = arith.constant 3.200000e+01 : f32
    %3 = vector.broadcast %cst_1 : f32 to vector<16x1xf32>
    %4 = arith.divf %2, %3 : vector<16x1xf32>
    %5 = vector.broadcast %4 : vector<16x1xf32> to vector<16x32xf32>
    %6 = arith.subf %0, %5 : vector<16x32xf32>
    %7 = arith.mulf %6, %6 : vector<16x32xf32>
    %cst_2 = arith.constant dense<0.000000e+00> : vector<16xf32>
    %8 = vector.multi_reduction <add>, %7, %cst_2 [1] : vector<16x32xf32> to vector<16xf32>
    %9 = vector.shape_cast %8 : vector<16xf32> to vector<16x1xf32>
    %cst_3 = arith.constant 3.100000e+01 : f32
    %10 = vector.broadcast %cst_3 : f32 to vector<16x1xf32>
    %11 = arith.divf %9, %10 : vector<16x1xf32>
    %12 = math.sqrt %11 : vector<16x1xf32>
    %cst_4 = arith.constant 9.99999997E-7 : f32
    %13 = vector.broadcast %cst_4 : f32 to vector<16x1xf32>
    %14 = arith.addf %12, %13 : vector<16x1xf32>
    %cst_5 = arith.constant 1.000000e+00 : f32
    %15 = vector.broadcast %cst_5 : f32 to vector<16x1xf32>
    %16 = arith.divf %15, %14 : vector<16x1xf32>
    %c0_6 = arith.constant 0 : index
    %c0_7 = arith.constant 0 : index
    %17 = vector.load %arg2[%c0_6, %c0_7] : memref<1x32xf32, #tpu.memory_space<vmem>>, vector<1x32xf32>
    %18 = vector.broadcast %17 : vector<1x32xf32> to vector<16x32xf32>
    %19 = arith.mulf %18, %6 : vector<16x32xf32>
    %20 = vector.broadcast %16 : vector<16x1xf32> to vector<16x32xf32>
    %21 = arith.mulf %19, %20 : vector<16x32xf32>
    %c0_8 = arith.constant 0 : index
    %c0_9 = arith.constant 0 : index
    %22 = vector.load %arg3[%c0_8, %c0_9] : memref<1x32xf32, #tpu.memory_space<vmem>>, vector<1x32xf32>
    %23 = vector.broadcast %22 : vector<1x32xf32> to vector<16x32xf32>
    %24 = arith.addf %21, %23 : vector<16x32xf32>
    %c0_10 = arith.constant 0 : index
    %c0_11 = arith.constant 0 : index
    %25 = vector.load %arg4[%c0_10, %c0_11] : memref<16x32xf32, #tpu.memory_space<vmem>>, vector<16x32xf32>
    tpu.vector_store %arg4[%c0_10, %c0_11], %24 {strides = array<i32>} : memref<16x32xf32, #tpu.memory_space<vmem>>, vector<16x32xf32>,
    return
  }
  func.func @transform_0(%arg0: i32) -> (i32, i32) {
    %c0_i32 = arith.constant 0 : i32
    %c0_i32_0 = arith.constant 0 : i32
    return %arg0, %c0_i32 : i32, i32
  }
  func.func @transform_1(%arg0: i32) -> (i32, i32) {
    %c0_i32 = arith.constant 0 : i32
    %c0_i32_0 = arith.constant 0 : i32
    %c0_i32_1 = arith.constant 0 : i32
    return %c0_i32, %c0_i32_0 : i32, i32
  }
  func.func @transform_2(%arg0: i32) -> (i32, i32) {
    %c0_i32 = arith.constant 0 : i32
    %c0_i32_0 = arith.constant 0 : i32
    %c0_i32_1 = arith.constant 0 : i32
    return %c0_i32, %c0_i32_0 : i32, i32
  }
  func.func @transform_3(%arg0: i32) -> (i32, i32) {
    %c0_i32 = arith.constant 0 : i32
    %c0_i32_0 = arith.constant 0 : i32
    return %arg0, %c0_i32 : i32, i32
  }
}

</mosaic_0001>

<bundles_post_ra>
// kernel: tpu_custom_call.1
= control target key start
LH: loop header
LB: loop body
LE: loop exit
PB: predicated region body
PF: predicated region fallthrough
CT: control target
= control target key end

     0   :  { %8 = vsyncpa [#allocation3], 0  ;;  %s241_s0 = inlined_call_operand.hbm [shape: f32[16,32], index: 0, kind: input, shape index: {}]   ;;  %s242_s1 = inlined_call_operand.vmem [shape: f32[1,32], index: 1, kind: input, shape index: {}]   ;;  %s243_s2 = inlined_call_operand.vmem [shape: f32[1,32], index: 2, kind: input, shape index: {}]   ;;  %s244_s3 = inlined_call_operand.hbm [shape: f32[16,32], index: 3, kind: output, shape index: {}]  }
   0x1   :  { %9 = vsyncpa [#allocation4], 0  ;;  %s175_s12 = smov [#allocation2]   ;;  %s127_s16 = scalar_lea.hbm %s241_s0, 256 }
   0x2   :  { %s15_s13 = sshll.u32 %s175_s12, 4  ;;  %p128_p0 = scmp.ne.s32.totalorder %s241_s0, %s127_s16  ;;  %s16_s13 = int_to_ptr.vmem [resolvable:$true] %s15_s13 }
   0x3   :  { %p131_p1 = scmp.lt.u32.totalorder %s127_s16, %s241_s0 }
   0x5   :  { %p133_p2 = pnand %p131_p1, %p128_p0 }
   0x7   :  { %136 = shalt.err (!%p133_p2)
}
   0x8   :  { %s137_s21 = scalar_lea.vmem %s16_s13, 256  ;;  %p142_p4 = scmp.lt.s32.totalorder %s16_s13, %s16_s13 }
   0x9   :  { %p138_p3 = scmp.ne.s32.totalorder %s16_s13, %s137_s21  ;;  %p143_p5 = scmp.lt.s32.totalorder %s137_s21, %s137_s21 }
   0xb   :  { %p144_p6 = por %p143_p5, %p142_p4 }
   0xd   :  { %p145_p7 = pnand %p144_p6, %p138_p3 }
   0xf   :  { %148 = shalt.err (!%p145_p7)
}
  0x10   :  { %s176_s22 = smov 128   ;;  %s177_s23 = smov 8  }
  0x11   :  { %21 = dma.hbm_to_vmem [thread:$0]  %s241_s0, 256, %s16_s13, [#allocation3], %s176_s22, %s176_s22, %s177_s23  }
  0x12   :  { %171 = dma.done.wait [#allocation3], 256  }
  0x13   :  { %172 = vsyncadd [#allocation3], 4294967040  ;;  %vm31_vm0 = vcmask 261120   ;;  %v29_v0 = vld [vmem:[#allocation2] sm:$0xff]  ;;  %v30_v1 = vld [vmem:[#allocation2 + $0x8] sm:$0xff]  ;;  %s178_s29 = smov [#allocation5]  }
  0x14   :  { %v32_v2 = vsel %vm31_vm0, %v29_v0, 0.0  ;;  %v35_v3 = vsel %vm31_vm0, %v30_v1, 0.0  ;;  %v113_v30 = vld [vmem:[%s242_s1] ss:$0 sm:$0xff]  ;;  %s101_s30 = sshll.u32 %s178_s29, 4  ;;  %s102_s30 = int_to_ptr.vmem [resolvable:$true] %s101_s30 }
  0x15   :  { %33 = vadd.xlane.f32.xlu0 %v32_v2  ;;  %v114_v33 = vld [vmem:[%s243_s2] ss:$0 sm:$0xff]  ;;  %s149_s1 = scalar_lea.vmem %s102_s30, 256  ;;  %p154_p9 = scmp.lt.s32.totalorder %s102_s30, %s102_s30 }
  0x16   :  { %p150_p8 = scmp.ne.s32.totalorder %s102_s30, %s149_s1  ;;  %p155_p10 = scmp.lt.s32.totalorder %s149_s1, %s149_s1 }
  0x18   :  { %p156_p11 = por %p155_p10, %p154_p9 }
  0x19   :  { %36 = vadd.xlane.f32.xlu0 %v35_v3 }
  0x1a   :  { %p157_p12 = pnand %p156_p11, %p150_p8 }
  0xa2   :  { %v34_v4 = vpop.xlane.xlu0 %33 }
  0xa3   :  { %v39_v5 = vmul.f32 0.03125, %v34_v4 }
  0xa5   :  { %v41_v6 = vsub.f32 %v29_v0, %v39_v5 }
  0xa6   :  { %v37_v7 = vpop.xlane.xlu0 %36 }
  0xa7   :  { %v40_v8 = vmul.f32 0.03125, %v37_v7  ;;  %v43_v9 = vmul.f32 %v41_v6, %v41_v6  ;;  %v81_v31 = vmul.f32 %v113_v30, %v41_v6 }
  0xa9   :  { %v42_v10 = vsub.f32 %v30_v1, %v40_v8  ;;  %v45_v11 = vsel %vm31_vm0, %v43_v9, 0.0 }
  0xaa   :  { %46 = vadd.xlane.f32.xlu1 %v45_v11 }
  0xab   :  { %v44_v12 = vmul.f32 %v42_v10, %v42_v10  ;;  %v82_v35 = vmul.f32 %v113_v30, %v42_v10 }
  0xad   :  { %v48_v13 = vsel %vm31_vm0, %v44_v12, 0.0 }
  0xae   :  { %49 = vadd.xlane.f32.xlu1 %v48_v13 }
 0x137   :  { %v47_v14 = vpop.xlane.xlu1 %46 }
 0x138   :  { %v52_v15 = vmul.f32 0.032258064, %v47_v14 }
 0x13a   :  { %119 = vrsqrt.f32 %v52_v15  ;;  %vm56_vm1 = vcmp.eq.f32.partialorder %v52_v15, inf  ;;  %v59_v20 = vand.u32 2147483648, %v52_v15  ;;  %vm58_vm2 = vcmp.eq.f32.partialorder %v52_v15, 0.0 }
 0x13b   :  { %v50_v16 = vpop.xlane.xlu1 %49 }
 0x13c   :  { %v53_v17 = vmul.f32 0.032258064, %v50_v16 }
 0x13e   :  { %121 = vrsqrt.f32 %v53_v17  ;;  %vm63_vm3 = vcmp.eq.f32.partialorder %v53_v17, inf  ;;  %v66_v26 = vand.u32 2147483648, %v53_v17  ;;  %vm65_vm4 = vcmp.eq.f32.partialorder %v53_v17, 0.0 }
 0x144   :  { %v120_v18 = vpop.eup %119 }
 0x145   :  { %v55_v19 = vmul.f32 %v120_v18, %v52_v15 }
 0x147   :  { %v57_v21 = vsel %vm56_vm1, %v52_v15, %v55_v19 }
 0x148   :  { %v122_v22 = vpop.eup %121  ;;  %v60_v23 = vsel %vm58_vm2, %v59_v20, %v57_v21 }
 0x149   :  { %v68_v24 = vadd.f32 1e-06, %v60_v23  ;;  %v62_v25 = vmul.f32 %v122_v22, %v53_v17 }
 0x14b   :  { %v64_v27 = vsel %vm63_vm3, %v53_v17, %v62_v25  ;;  %123 = vrcp.f32 %v68_v24 }
 0x14c   :  { %v67_v28 = vsel %vm65_vm4, %v66_v26, %v64_v27 }
 0x14d   :  { %v69_v29 = vadd.f32 1e-06, %v67_v28 }
 0x14f   :  { %125 = vrcp.f32 %v69_v29 }
 0x155   :  { %v124_v32 = vpop.eup %123 }
 0x156   :  { %v83_v34 = vmul.f32 %v124_v32, %v81_v31 }
 0x158   :  { %v92_v36 = vadd.f32 %v114_v33, %v83_v34 }
 0x159   :  { %v126_v37 = vpop.eup %125 }
 0x15a   :  { %v84_v38 = vmul.f32 %v126_v37, %v82_v35  ;;  %94 = vst.msk [vmem:[#allocation5] sm:$0xff] %vm31_vm0, %v92_v36 }
 0x15c   :  { %v93_v39 = vadd.f32 %v114_v33, %v84_v38 }
 0x15e   :  { %95 = vst.msk [vmem:[#allocation5 + $0x8] sm:$0xff] %vm31_vm0, %v93_v39 }
 0x15f   :  { %160 = shalt.err (!%p157_p12)
}
 0x160   :  { %s161_s5 = scalar_lea.hbm %s244_s3, 256 }
 0x161   :  { %p162_p13 = scmp.ne.s32.totalorder %s244_s3, %s161_s5  ;;  %p165_p0 = scmp.lt.u32.totalorder %s161_s5, %s244_s3 }
 0x163   :  { %p167_p1 = pnand %p165_p0, %p162_p13 }
 0x165   :  { %170 = shalt.err (!%p167_p1)
}
 0x166   :  { %107 = dma.vmem_to_hbm [thread:$0]  %s102_s30, 256, %s244_s3, [#allocation4], %s176_s22, %s176_s22, %s177_s23  }
 0x167   :  { %173 = dma.done.wait [#allocation4], 256  }
 0x168   :  { %174 = vsyncadd [#allocation4], 4294967040 }
 0x169   :  { %111 = vsyncpa [#allocation3], 1 }
 0x16a   :  { %112 = vsyncpa [#allocation4], 1 }

</bundles_post_ra>
